<compile_context>
chip_gen: v7x
topology: tpu7x:2x2x1
jax: 0.10.0
libtpu: 0.0.40
codegen_flags: <defaults>
</compile_context>

<pallas_src>
import math

import jax
import jax.numpy as jnp
from jax.experimental import pallas as pl
from jax.experimental.pallas import tpu as pltpu


def _sublane_multiple(dtype):
    """Native sublane tiling multiple for a dtype (4B: 8, 2B: 16, 1B: 32)."""
    return {4: 8, 2: 16, 1: 32}.get(dtype.itemsize, 8)


def _ceil_to(x, m):
    return -(-x // m) * m


def _choose_tile_rows(rows_needed, chans, pred_itemsize, sub_mult,
                      max_tile_bytes=4 << 20):
    """Rows per block: ~max_tile_bytes of prediction data, multiple of sub_mult."""
    per_row_bytes = max(chans * 128 * pred_itemsize, 1)
    budget = max(sub_mult, (max_tile_bytes // per_row_bytes) // sub_mult * sub_mult)
    needed = _ceil_to(max(rows_needed, 1), sub_mult)
    return min(budget, needed)


def _make_dice_kernel(mode, from_logits, num_classes, tile_rows, kt_per_split,
                      valid_elems, has_pad):
    """Per-(batch, split, row-tile) reduction kernel. All args are compile-time."""
    C, R = num_classes, tile_rows
    G = R // 8

    def kernel(p_ref, t_ref, out_ref):
        s = pl.program_id(1)
        k = pl.program_id(2)

        @pl.when(k == 0)
        def _():
            out_ref[...] = jnp.zeros_like(out_ref)

        p = p_ref[0].astype(jnp.float32)          # (C, R, 128) or (R, 128)

        if from_logits:
            if mode == "binary":
                p = jax.nn.sigmoid(p)
            else:
                # Hand-rolled softmax over the (leading) class axis; flip
                # approx=True if from_logits multiclass becomes the hot path on v7x.
                m = jnp.max(p, axis=0, keepdims=True)
                e = jnp.exp(p - m)
                p = e * pl.reciprocal(jnp.sum(e, axis=0, keepdims=True), approx=False)

        if mode == "multiclass":
            lab = t_ref[0].astype(jnp.int32)      # (R, 128); labels stay narrow in HBM
            cls = jax.lax.broadcasted_iota(jnp.int32, (C, R, 128), 0)
            t = (lab[None, :, :] == cls).astype(jnp.float32)   # on-chip one-hot
        else:
            t = t_ref[0].astype(jnp.float32)      # (R, 128); widen on-chip

        if has_pad:
            # Zero out padded positions (flattened index >= valid_elems).
            row0 = (s * kt_per_split + k) * R
            rr = jax.lax.broadcasted_iota(jnp.int32, (R, 128), 0)
            ll = jax.lax.broadcasted_iota(jnp.int32, (R, 128), 1)
            mask = (((row0 + rr) * 128 + ll) < valid_elems).astype(jnp.float32)
            if mode == "multiclass":
                p = p * mask[None]
                t = t * mask[None]
            else:
                p = p * mask
                t = t * mask

        inter = p * t

        if mode == "multiclass":
            def fold(x):                          # (C, R, 128) -> (C, 8, 128): VPU adds
                return x.reshape(C, G, 8, 128).sum(axis=1)
            out_ref[0, 0:C] += fold(inter)
            out_ref[0, C:2 * C] += fold(p)
            out_ref[0, 2 * C:3 * C] += fold(t)
        else:
            def fold(x):                          # (R, 128) -> (8, 128): VPU adds
                return x.reshape(G, 8, 128).sum(axis=0)
            out_ref[0, 0] += fold(inter)
            out_ref[0, 1] += fold(p)
            out_ref[0, 2] += fold(t)

    return kernel


def dice_loss(y_pred, y_true, *, mode, smooth=1e-5, from_logits=False,
              ignore_index=None, eps=1e-7, tile_rows=None, core_split=None,
              max_tile_bytes=4 << 20):
    """JAX/Pallas equivalent of DiceLoss.forward.

    y_pred: (B, C, D, H, W) float (any float dtype; widened to f32 on-chip)
    y_true: 'binary'     -> same shape as y_pred, {0,1} values (any numeric dtype)
            'multiclass' -> (B, D, H, W) or (B, 1, D, H, W) integer class labels
    """
    # TODO(synk): ignore_index / eps are accepted but (exactly as in the reference
    # forward) never used, so they are intentionally not implemented.
    del ignore_index, eps
    if mode not in ("binary", "multiclass"):
        raise ValueError("Unsupported mode. Choose 'binary' or 'multiclass'.")

    B, C = int(y_pred.shape[0]), int(y_pred.shape[1])
    N = int(math.prod(y_pred.shape[2:]))
    multiclass = mode == "multiclass"

    # ---- flatten; keep native dtypes in HBM (widen on-chip) ----------------
    if multiclass:
        p = y_pred.reshape(B, C, N)
        t = y_true
        if (jnp.issubdtype(t.dtype, jnp.floating) or t.dtype == jnp.bool_
                or t.dtype.itemsize > 4):
            t = t.astype(jnp.int32)               # narrow int labels pass through
        t = t.reshape(B, N)                       # handles (B,D,H,W) and (B,1,D,H,W)
        chans, valid = C, N
    else:
        M = C * N                                 # per-class sums are summed away ->
        p = y_pred.reshape(B, M)                  # fold the class axis into lanes
        t = y_true
        if t.dtype == jnp.bool_:
            t = t.astype(jnp.uint8)
        elif t.dtype.itemsize > 4:
            t = t.astype(jnp.float32)
        t = t.reshape(B, M)
        chans, valid = 1, M

    sub_mult = max(_sublane_multiple(p.dtype), _sublane_multiple(t.dtype))
    rows_needed = _ceil_to(valid, 128) // 128

    if tile_rows is None:
        R = _choose_tile_rows(rows_needed, chans, p.dtype.itemsize, sub_mult,
                              max_tile_bytes)
    else:
        R = _ceil_to(int(tile_rows), sub_mult)

    n_row_tiles = _ceil_to(rows_needed, R) // R
    S = int(core_split) if core_split is not None else (2 if n_row_tiles >= 2 else 1)
    S = max(S, 1)

    rows_pad = _ceil_to(rows_needed, R * S)
    kt = rows_pad // (R * S)
    pad = rows_pad * 128 - valid
    has_pad = pad > 0

    if has_pad:
        if multiclass:
            p = jnp.pad(p, ((0, 0), (0, 0), (0, pad)))
        else:
            p = jnp.pad(p, ((0, 0), (0, pad)))
        t = jnp.pad(t, ((0, 0), (0, pad)))

    if multiclass:
        p = p.reshape(B, C, rows_pad, 128)
        p_spec = pl.BlockSpec((1, C, R, 128), lambda b, s, k: (b, 0, s * kt + k, 0))
    else:
        p = p.reshape(B, rows_pad, 128)
        p_spec = pl.BlockSpec((1, R, 128), lambda b, s, k: (b, s * kt + k, 0))
    t = t.reshape(B, rows_pad, 128)
    t_spec = pl.BlockSpec((1, R, 128), lambda b, s, k: (b, s * kt + k, 0))

    out_chans = 3 * chans
    out_spec = pl.BlockSpec((1, out_chans, 8, 128),
                            lambda b, s, k: (b * S + s, 0, 0, 0))

    kernel = _make_dice_kernel(mode, from_logits, chans, R, kt, valid, has_pad)

    # VMEM budget: double-buffered input tiles + the tiny resident output slab.
    pred_tile_bytes = chans * R * 128 * p.dtype.itemsize
    tgt_tile_bytes = R * 128 * t.dtype.itemsize
    out_tile_bytes = out_chans * 8 * 128 * 4
    footprint = 2 * (pred_tile_bytes + tgt_tile_bytes + out_tile_bytes)
    vmem_limit = int(min(max(32 << 20, 2 * footprint), 48 << 20))

    sums = pl.pallas_call(
        kernel,
        out_shape=jax.ShapeDtypeStruct((B * S, out_chans, 8, 128), jnp.float32),
        grid_spec=pltpu.PrefetchScalarGridSpec(
            num_scalar_prefetch=0,
            grid=(B, S, kt),
            in_specs=[p_spec, t_spec],
            out_specs=out_spec,
        ),
        compiler_params=pltpu.CompilerParams(
            dimension_semantics=("parallel", "parallel", "arbitrary"),
            vmem_limit_bytes=vmem_limit),
    )(p, t)

    # ---- tiny JAX glue: fold the (S, 8, 128) partials and form the dice ----
    per = sums.reshape(B, S, 3, chans, 8, 128).sum(axis=(1, 4, 5))   # (B, 3, chans)
    inter, psum, tsum = per[:, 0], per[:, 1], per[:, 2]

    if multiclass:
        intersection = inter                      # (B, C)
        union = psum + tsum
    else:
        intersection = inter[:, 0]                # (B,)
        union = psum[:, 0] + tsum[:, 0]

    dice = (2.0 * intersection + smooth) / (union + smooth)
    return 1.0 - dice.mean()


# ------------------------- pure-JAX reference -------------------------
def dice_loss_ref(y_pred, y_true, *, mode, smooth=1e-5, from_logits=False):
    y_pred = y_pred.astype(jnp.float32)
    if from_logits:
        y_pred = (jax.nn.sigmoid(y_pred) if mode == "binary"
                  else jax.nn.softmax(y_pred, axis=1))
    if mode == "binary":
        t = y_true.astype(jnp.float32)
        inter = (y_pred * t).sum(axis=(1, 2, 3, 4))
        union = y_pred.sum(axis=(1, 2, 3, 4)) + t.sum(axis=(1, 2, 3, 4))
    else:
        C = y_pred.shape[1]
        lab = y_true.astype(jnp.int32).reshape(y_true.shape[0], *y_pred.shape[2:])
        t = jax.nn.one_hot(lab, C, dtype=jnp.float32)
        t = jnp.moveaxis(t, -1, 1)                # (B, C, D, H, W)
        inter = (y_pred * t).sum(axis=(2, 3, 4))
        union = y_pred.sum(axis=(2, 3, 4)) + t.sum(axis=(2, 3, 4))
    dice = (2.0 * inter + smooth) / (union + smooth)
    return 1.0 - dice.mean()


if __name__ == "__main__":
    key = jax.random.PRNGKey(0)
    ks = jax.random.split(key, 8)

    def check(name, got, want, tol=1e-4):
        got = jax.block_until_ready(got)
        assert jnp.allclose(got, want, atol=tol, rtol=tol), (name, got, want)

    B, C = 2, 4

    # -- multiclass: (B, C, 4, 32, 32) logits, int32 labels (N = 4096 -> 32 rows)
    yp_mc = jax.random.normal(ks[0], (B, C, 4, 32, 32), dtype=jnp.float32)
    yt_mc = jax.random.randint(ks[1], (B, 4, 32, 32), 0, C, dtype=jnp.int32)
    ref_mc = dice_loss_ref(yp_mc, yt_mc, mode="multiclass", from_logits=True)

    check("mc/default",
          dice_loss(yp_mc, yt_mc, mode="multiclass", from_logits=True), ref_mc)
    check("mc/k-accum",      # small tiles, single split: cross-tile accumulation
          dice_loss(yp_mc, yt_mc, mode="multiclass", from_logits=True,
                    tile_rows=8, core_split=1), ref_mc)
    check("mc/core-split",   # small tiles, 2-way reduction split (v7x megacore path)
          dice_loss(yp_mc, yt_mc, mode="multiclass", from_logits=True,
                    tile_rows=8, core_split=2), ref_mc)

    # -- multiclass ragged: N = 105 (not a multiple of 128), (B,1,D,H,W) labels
    yp_mc2 = jax.random.normal(ks[2], (B, C, 3, 5, 7), dtype=jnp.float32)
    yt_mc2 = jax.random.randint(ks[3], (B, 1, 3, 5, 7), 0, C, dtype=jnp.int32)
    check("mc/ragged",
          dice_loss(yp_mc2, yt_mc2, mode="multiclass", from_logits=True),
          dice_loss_ref(yp_mc2, yt_mc2, mode="multiclass", from_logits=True))

    # -- binary: (B, 1, 4, 8, 8) logits, float {0,1} targets
    yp_b = jax.random.normal(ks[4], (B, 1, 4, 8, 8), dtype=jnp.float32)
    yt_b = (jax.random.uniform(ks[5], (B, 1, 4, 8, 8)) > 0.5).astype(jnp.float32)
    check("bin/logits",
          dice_loss(yp_b, yt_b, mode="binary", from_logits=True),
          dice_loss_ref(yp_b, yt_b, mode="binary", from_logits=True))

    # -- binary, C = 2, probabilities, uint8 targets (narrow targets stay narrow in HBM)
    yp_b2 = jax.random.uniform(ks[6], (B, 2, 3, 5, 7), dtype=jnp.float32)
    yt_b2 = (jax.random.uniform(ks[7], (B, 2, 3, 5, 7)) > 0.5).astype(jnp.uint8)
    check("bin/uint8",
          dice_loss(yp_b2, yt_b2, mode="binary", from_logits=False),
          dice_loss_ref(yp_b2, yt_b2, mode="binary", from_logits=False))

    print("KERNEL_OK")
</pallas_src>

<mosaic_0001>
module attributes {stable_mosaic.version = 11 : i64} {
  func.func @kernel(%arg0: i32, %arg1: i32, %arg2: i32, %arg3: memref<1x4x32x128xf32, #tpu.memory_space<vmem>>, %arg4: memref<1x32x128xi32, #tpu.memory_space<vmem>>, %arg5: memref<1x12x8x128xf32, #tpu.memory_space<vmem>>) attributes {dimension_semantics = [#tpu.dimension_semantics<parallel>, #tpu.dimension_semantics<parallel>, #tpu.dimension_semantics<arbitrary>], iteration_bounds = array<i64: 2, 1, 1>, scalar_prefetch = 0 : i64, scratch_operands = 0 : i64, tpu.core_type = #tpu.core_type<tc>, window_params = [{transform_indices = @transform_0, window_bounds = array<i64: 1, 4, 32, 128>}, {transform_indices = @transform_1, window_bounds = array<i64: 1, 32, 128>}, {transform_indices = @transform_2, window_bounds = array<i64: 1, 12, 8, 128>}]} {
    %c0_i32 = arith.constant 0 : i32
    %0 = arith.cmpi eq, %arg2, %c0_i32 : i32
    %1 = arith.extui %0 : i1 to i32
    %c0_i32_0 = arith.constant 0 : i32
    %2 = arith.cmpi ne, %1, %c0_i32_0 : i32
    scf.if %2 {
      %cst_33 = arith.constant 0.000000e+00 : f32
      %48 = vector.broadcast %cst_33 : f32 to vector<1x12x8x128xf32>
      %c0_34 = arith.constant 0 : index
      %c0_35 = arith.constant 0 : index
      %c0_36 = arith.constant 0 : index
      %c0_37 = arith.constant 0 : index
      %49 = vector.load %arg5[%c0_34, %c0_35, %c0_36, %c0_37] : memref<1x12x8x128xf32, #tpu.memory_space<vmem>>, vector<1x12x8x128xf32>
      tpu.vector_store %arg5[%c0_34, %c0_35, %c0_36, %c0_37], %48 {strides = array<i32>} : memref<1x12x8x128xf32, #tpu.memory_space<vmem>>, vector<1x12x8x128xf32>,
    } else {
    }
    %c0 = arith.constant 0 : index
    %c0_1 = arith.constant 0 : index
    %c0_2 = arith.constant 0 : index
    %c0_3 = arith.constant 0 : index
    %3 = vector.load %arg3[%c0, %c0_1, %c0_2, %c0_3] : memref<1x4x32x128xf32, #tpu.memory_space<vmem>>, vector<1x4x32x128xf32>
    %4 = vector.shape_cast %3 : vector<1x4x32x128xf32> to vector<4x32x128xf32>
    %cst = arith.constant dense<0xFF800000> : vector<32x128xf32>
    %5 = vector.multi_reduction <maximumf>, %4, %cst [0] : vector<4x32x128xf32> to vector<32x128xf32>
    %6 = vector.shape_cast %5 : vector<32x128xf32> to vector<1x32x128xf32>
    %7 = vector.broadcast %6 : vector<1x32x128xf32> to vector<4x32x128xf32>
    %8 = arith.subf %4, %7 : vector<4x32x128xf32>
    %9 = math.exp %8 : vector<4x32x128xf32>
    %cst_4 = arith.constant dense<0.000000e+00> : vector<32x128xf32>
    %10 = vector.multi_reduction <add>, %9, %cst_4 [0] : vector<4x32x128xf32> to vector<32x128xf32>
    %11 = vector.shape_cast %10 : vector<32x128xf32> to vector<1x32x128xf32>
    %12 = tpu.reciprocal %11 : vector<1x32x128xf32> -> vector<1x32x128xf32>
    %13 = vector.broadcast %12 : vector<1x32x128xf32> to vector<4x32x128xf32>
    %14 = arith.mulf %9, %13 : vector<4x32x128xf32>
    %c0_5 = arith.constant 0 : index
    %c0_6 = arith.constant 0 : index
    %c0_7 = arith.constant 0 : index
    %15 = vector.load %arg4[%c0_5, %c0_6, %c0_7] : memref<1x32x128xi32, #tpu.memory_space<vmem>>, vector<1x32x128xi32>
    %16 = vector.shape_cast %15 : vector<1x32x128xi32> to vector<32x128xi32>
    %17 = tpu.iota {dimensions = array<i32: 0>} : vector<4x32x128xi32>
    %18 = vector.shape_cast %16 : vector<32x128xi32> to vector<1x32x128xi32>
    %19 = vector.broadcast %18 : vector<1x32x128xi32> to vector<4x32x128xi32>
    %20 = arith.cmpi eq, %19, %17 : vector<4x32x128xi32>
    %21 = arith.extui %20 : vector<4x32x128xi1> to vector<4x32x128xi32>
    %22 = arith.sitofp %21 : vector<4x32x128xi32> to vector<4x32x128xf32>
    %23 = arith.mulf %14, %22 : vector<4x32x128xf32>
    %c0_8 = arith.constant 0 : index
    %c0_9 = arith.constant 0 : index
    %c0_10 = arith.constant 0 : index
    %c0_11 = arith.constant 0 : index
    %24 = vector.load %arg5[%c0_8, %c0_9, %c0_10, %c0_11] : memref<1x12x8x128xf32, #tpu.memory_space<vmem>>, vector<1x4x8x128xf32>
    %25 = vector.shape_cast %24 : vector<1x4x8x128xf32> to vector<4x8x128xf32>
    %26 = vector.shape_cast %23 : vector<4x32x128xf32> to vector<4x4x8x128xf32>
    %cst_12 = arith.constant dense<0.000000e+00> : vector<4x8x128xf32>
    %27 = vector.multi_reduction <add>, %26, %cst_12 [1] : vector<4x4x8x128xf32> to vector<4x8x128xf32>
    %28 = arith.addf %25, %27 : vector<4x8x128xf32>
    %c0_13 = arith.constant 0 : index
    %c0_14 = arith.constant 0 : index
    %c0_15 = arith.constant 0 : index
    %c0_16 = arith.constant 0 : index
    %29 = vector.load %arg5[%c0_13, %c0_14, %c0_15, %c0_16] : memref<1x12x8x128xf32, #tpu.memory_space<vmem>>, vector<1x4x8x128xf32>
    %30 = vector.shape_cast %29 : vector<1x4x8x128xf32> to vector<4x8x128xf32>
    %31 = vector.shape_cast %28 : vector<4x8x128xf32> to vector<1x4x8x128xf32>
    tpu.vector_store %arg5[%c0_13, %c0_14, %c0_15, %c0_16], %31 {strides = array<i32>} : memref<1x12x8x128xf32, #tpu.memory_space<vmem>>, vector<1x4x8x128xf32>,
    %c0_17 = arith.constant 0 : index
    %c4 = arith.constant 4 : index
    %c0_18 = arith.constant 0 : index
    %c0_19 = arith.constant 0 : index
    %32 = vector.load %arg5[%c0_17, %c4, %c0_18, %c0_19] : memref<1x12x8x128xf32, #tpu.memory_space<vmem>>, vector<1x4x8x128xf32>
    %33 = vector.shape_cast %32 : vector<1x4x8x128xf32> to vector<4x8x128xf32>
    %34 = vector.shape_cast %14 : vector<4x32x128xf32> to vector<4x4x8x128xf32>
    %cst_20 = arith.constant dense<0.000000e+00> : vector<4x8x128xf32>
    %35 = vector.multi_reduction <add>, %34, %cst_20 [1] : vector<4x4x8x128xf32> to vector<4x8x128xf32>
    %36 = arith.addf %33, %35 : vector<4x8x128xf32>
    %c0_21 = arith.constant 0 : index
    %c4_22 = arith.constant 4 : index
    %c0_23 = arith.constant 0 : index
    %c0_24 = arith.constant 0 : index
    %37 = vector.load %arg5[%c0_21, %c4_22, %c0_23, %c0_24] : memref<1x12x8x128xf32, #tpu.memory_space<vmem>>, vector<1x4x8x128xf32>
    %38 = vector.shape_cast %37 : vector<1x4x8x128xf32> to vector<4x8x128xf32>
    %39 = vector.shape_cast %36 : vector<4x8x128xf32> to vector<1x4x8x128xf32>
    tpu.vector_store %arg5[%c0_21, %c4_22, %c0_23, %c0_24], %39 {strides = array<i32>} : memref<1x12x8x128xf32, #tpu.memory_space<vmem>>, vector<1x4x8x128xf32>,
    %c0_25 = arith.constant 0 : index
    %c8 = arith.constant 8 : index
    %c0_26 = arith.constant 0 : index
    %c0_27 = arith.constant 0 : index
    %40 = vector.load %arg5[%c0_25, %c8, %c0_26, %c0_27] : memref<1x12x8x128xf32, #tpu.memory_space<vmem>>, vector<1x4x8x128xf32>
    %41 = vector.shape_cast %40 : vector<1x4x8x128xf32> to vector<4x8x128xf32>
    %42 = vector.shape_cast %22 : vector<4x32x128xf32> to vector<4x4x8x128xf32>
    %cst_28 = arith.constant dense<0.000000e+00> : vector<4x8x128xf32>
    %43 = vector.multi_reduction <add>, %42, %cst_28 [1] : vector<4x4x8x128xf32> to vector<4x8x128xf32>
    %44 = arith.addf %41, %43 : vector<4x8x128xf32>
    %c0_29 = arith.constant 0 : index
    %c8_30 = arith.constant 8 : index
    %c0_31 = arith.constant 0 : index
    %c0_32 = arith.constant 0 : index
    %45 = vector.load %arg5[%c0_29, %c8_30, %c0_31, %c0_32] : memref<1x12x8x128xf32, #tpu.memory_space<vmem>>, vector<1x4x8x128xf32>
    %46 = vector.shape_cast %45 : vector<1x4x8x128xf32> to vector<4x8x128xf32>
    %47 = vector.shape_cast %44 : vector<4x8x128xf32> to vector<1x4x8x128xf32>
    tpu.vector_store %arg5[%c0_29, %c8_30, %c0_31, %c0_32], %47 {strides = array<i32>} : memref<1x12x8x128xf32, #tpu.memory_space<vmem>>, vector<1x4x8x128xf32>,
    return
  }
  func.func @transform_0(%arg0: i32, %arg1: i32, %arg2: i32) -> (i32, i32, i32, i32) {
    %c1_i32 = arith.constant 1 : i32
    %0 = arith.muli %arg1, %c1_i32 : i32
    %1 = arith.addi %0, %arg2 : i32
    %c0_i32 = arith.constant 0 : i32
    %c0_i32_0 = arith.constant 0 : i32
    %c0_i32_1 = arith.constant 0 : i32
    return %arg0, %c0_i32, %1, %c0_i32_0 : i32, i32, i32, i32
  }
  func.func @transform_1(%arg0: i32, %arg1: i32, %arg2: i32) -> (i32, i32, i32) {
    %c1_i32 = arith.constant 1 : i32
    %0 = arith.muli %arg1, %c1_i32 : i32
    %1 = arith.addi %0, %arg2 : i32
    %c0_i32 = arith.constant 0 : i32
    %c0_i32_0 = arith.constant 0 : i32
    return %arg0, %1, %c0_i32 : i32, i32, i32
  }
  func.func @transform_2(%arg0: i32, %arg1: i32, %arg2: i32) -> (i32, i32, i32, i32) {
    %c1_i32 = arith.constant 1 : i32
    %0 = arith.muli %arg0, %c1_i32 : i32
    %1 = arith.addi %0, %arg1 : i32
    %c0_i32 = arith.constant 0 : i32
    %c0_i32_0 = arith.constant 0 : i32
    %c0_i32_1 = arith.constant 0 : i32
    %c0_i32_2 = arith.constant 0 : i32
    return %1, %c0_i32, %c0_i32_0, %c0_i32_1 : i32, i32, i32, i32
  }
}

</mosaic_0001>

<bundles_post_ra>
// kernel: tpu_custom_call.1
= control target key start
LH: loop header
LB: loop body
LE: loop exit
PB: predicated region body
PF: predicated region fallthrough
CT: control target
= control target key end

     0   :  { %7 = vsyncpa [#allocation3], 0  ;;  %s1343_s0 = inlined_call_operand.hbm [shape: f32[2,4,32,128], index: 0, kind: input, shape index: {}]   ;;  %s1344_s1 = inlined_call_operand.hbm [shape: s32[2,32,128], index: 1, kind: input, shape index: {}]   ;;  %s1345_s2 = inlined_call_operand.hbm [shape: f32[2,12,8,128], index: 2, kind: output, shape index: {}]  }
   0x1   :  { %9 = vsyncpa [#allocation3 + $0x1], 0 }
   0x2   :  { %10 = vsyncpa [#allocation6], 0 }
   0x3   :  { %12 = vsyncpa [#allocation6 + $0x1], 0 }
   0x4   :  { %13 = vsyncpa [#allocation4], 0 }
   0x5   :  { %15 = vsyncpa [#allocation4 + $0x1], 0  ;;  %s974_s9 = smov 0   ;;  %s976_s10 = smov 0  }
   0x6   :  { %s978_s11 = smov 0   ;;  %s980_s12 = smov 0  }
   0x7   :  { %s982_s13 = smov 0   ;;  %s984_s14 = smov 0  }
   0x8 LB: > { %s639_s15 = sadd.s32 4294967295, %s949_s14   ;;  %s640_s16 = sadd.s32 4294967294, %s949_s14   ;;  %s949_s14 = sphi %s984_s14, %s21_s14   ;;  %s945_s13 = sphi %s982_s13, %s1363_s13   ;;  %s941_s12 = sphi %s980_s12, %s1362_s12   ;;  %s937_s11 = sphi %s978_s11, %s1361_s11   ;;  %s933_s10 = sphi %s976_s10, %s1360_s10   ;;  %s929_s9 = sphi %s974_s9, %s1359_s9  }
   0x9   : > { %s40_s17 = sadd.s32 1, %s945_s13  ;;  %s51_s18 = sadd.s32 1, %s937_s11 }
   0xa   : > { %p42_p0 = scmp.ge.s32.totalorder %s40_s17, 2  ;;  %p58_p1 = scmp.ne.s32.totalorder %s937_s11, %s933_s10 }
   0xb   : > { %p59_p2 = scmp.eq.s32.totalorder %s949_s14, 0  ;;  %p64_p3 = scmp.ne.s32.totalorder %s933_s10, %s929_s9 }
   0xc   : > { %s1365_s17 = smov (%p42_p0, %s40_s17), 0  ;;  %p65_p5 = scmp.eq.s32.totalorder %s639_s15, 0 }
   0xd   : > { %p1015_p4 = por %p59_p2, %p58_p1  ;;  %s46_s20 = ssub.s32 %s945_s13, %s1365_s17 }
   0xe   : > { %p120_p6 = scmp.eq.s32.totalorder %s639_s15, 1  ;;  %p49_p7 = scmp.eq.s32.totalorder %s46_s20, 0 }
   0xf   : > { %p1021_p8 = por %p65_p5, %p64_p3  ;;  %p126_p10 = scmp.eq.s32.totalorder %s640_s16, 1 }
  0x10   : > { %p1025_p9 = por %p120_p6, %p58_p1  ;;  %p708_p13 = scmp.lt.s32.totalorder %s949_s14, 2 }
  0x11   : > { %s1349_s21 = scalar_select %p1021_p8, 1, 0 }
  0x12   : > { %s1350_s22 = scalar_select %p1025_p9, 1, 0 }
  0x13   : > { %s1030_s23 = scalar_select %p49_p7, %s937_s11, %s51_s18  }
  0x14   : > { %p1032_p11 = por %p126_p10, %p64_p3  ;;  %s1039_s25 = sand.u32 1, %s937_s11  }
  0x15   : > { %s643_s26 = sshll.u32 %s1039_s25, 7  ;;  %s687_s27 = sshll.u32 %s945_s13, 11 }
  0x16   : > { %s1351_s24 = scalar_select %p1032_p11, 1, 0 }
  0x17   : > { %s1046_s30 = scalar_lea.hbm %s1343_s0, %s687_s27  ;;  %s150_s3 = scalar_lea.vmem [#allocation2], %s643_s26 }
  0x18   : > { %s160_s4 = sshll.u32 %s150_s3, 4  ;;  %p1052_p0 = pnand %p708_p13, %p1015_p4  ;;  %s1048_s4 = int_to_ptr.vmem [resolvable:$true] %s160_s4 }
  0x19   : > { %s147_s6 = scalar_lea.sflag [#allocation3], %s1039_s25  ;;  %s803_s7 = scalar_lea.hbm %s1046_s30, 2048 }
  0x1a   : > { %p804_p2 = scmp.ne.s32.totalorder %s1046_s30, %s803_s7  ;;  %p805_p3 = pneg %p1052_p0 }
  0x1b   : > { %s808_s16 = scalar_lea.hbm %s1343_s0, 4096  ;;  %p809_p4 = scmp.lt.u32.totalorder %s1046_s30, %s1343_s0 }
  0x1c   : > { %p806_p5 = pnand %p805_p3, %p804_p2  ;;  %p810_p7 = scmp.lt.u32.totalorder %s808_s16, %s803_s7 }
  0x1d   : > { %p812_p13 = scmp.lt.u32.totalorder %s803_s7, %s1046_s30 }
  0x1e   : > { %p807_p6 = pneg %p806_p5  ;;  %p811_p10 = por %p810_p7, %p809_p4 }
  0x20   : > { %p813_p12 = por %p812_p13, %p811_p10 }
  0x22   : > { %p814_p1 = pnand %p813_p12, %p807_p6 }
  0x24   : > { %817 = shalt.err (!%p814_p1)
}
  0x25   : > { %s818_s20 = scalar_lea.vmem %s1048_s4, 2048  ;;  %s951_s26 = smov [#allocation2]  }
  0x26   : > { %p819_p2 = scmp.ne.s32.totalorder %s1048_s4, %s818_s20  ;;  %s823_s27 = sshll.u32 %s951_s26, 4  ;;  %s824_s27 = int_to_ptr.vmem [resolvable:$false] %s823_s27 }
  0x27   : > { %s825_s28 = scalar_lea.vmem %s824_s27, 4096  ;;  %p826_p9 = scmp.lt.s32.totalorder %s1048_s4, %s824_s27 }
  0x28   : > { %p821_p5 = pnand %p819_p2, %p805_p3  ;;  %p827_p4 = scmp.lt.s32.totalorder %s825_s28, %s818_s20 }
  0x2a   : > { %p822_p11 = pneg %p821_p5  ;;  %p828_p7 = por %p827_p4, %p826_p9 }
  0x2c   : > { %p829_p10 = pnand %p828_p7, %p822_p11 }
  0x2e   : > { %832 = shalt.err (!%p829_p10)
}
  0x2f   : > { %s952_s29 = smov 128   ;;  %s953_s3 = smov 8  }
  0x30   : > { %700 = dma.hbm_to_vmem [thread:$0]  (!%p1052_p0), %s1046_s30, 2048, %s1048_s4, %s147_s6, %s952_s29, %s952_s29, %s953_s3  }
  0x31   : > { %p192_p9 = scmp.lt.s32.totalorder %s949_s14, 3  ;;  %s646_s7 = sshll.u32 %s1039_s25, 5 }
  0x32   : > { %s688_s8 = sshll.u32 %s945_s13, 9  ;;  %p1353_p11 = scmp.ge.s32.totalorder %s949_s14, 1 }
  0x33   : > { %s1100_s19 = scalar_lea.hbm %s1344_s1, %s688_s8  ;;  %s174_s20 = scalar_lea.vmem [#allocation5], %s646_s7 }
  0x34   : > { %p1093_p12 = pnand %p1353_p11, %p192_p9  ;;  %s184_s26 = sshll.u32 %s174_s20, 4  ;;  %s1102_s26 = int_to_ptr.vmem [resolvable:$true] %s184_s26 }
  0x35   : > { %s171_s30 = scalar_lea.sflag [#allocation6], %s1039_s25  ;;  %s833_s4 = scalar_lea.hbm %s1100_s19, 512 }
  0x36   : > { %p834_p1 = scmp.ne.s32.totalorder %s1100_s19, %s833_s4  ;;  %s838_s28 = scalar_lea.hbm %s1344_s1, 1024 }
  0x37   : > { %p839_p2 = scmp.lt.u32.totalorder %s1100_s19, %s1344_s1  ;;  %p840_p5 = scmp.lt.u32.totalorder %s838_s28, %s833_s4 }
  0x38   : > { %p836_p6 = pnand %p834_p1, %p805_p3  ;;  %p842_p7 = scmp.lt.u32.totalorder %s833_s4, %s1100_s19 }
  0x39   : > { %p841_p4 = por %p840_p5, %p839_p2 }
  0x3a   : > { %p837_p13 = pneg %p836_p6 }
  0x3b   : > { %p843_p10 = por %p842_p7, %p841_p4 }
  0x3d   : > { %p844_p9 = pnand %p843_p10, %p837_p13 }
  0x3f   : > { %847 = shalt.err (!%p844_p9)
}
  0x40   : > { %s848_s7 = scalar_lea.vmem %s1102_s26, 512  ;;  %s954_s18 = smov [#allocation5]  }
  0x41   : > { %p849_p11 = scmp.ne.s32.totalorder %s1102_s26, %s848_s7  ;;  %s853_s20 = sshll.u32 %s954_s18, 4  ;;  %s854_s20 = int_to_ptr.vmem [resolvable:$false] %s853_s20 }
  0x42   : > { %s855_s6 = scalar_lea.vmem %s854_s20, 1024  ;;  %p856_p8 = scmp.lt.s32.totalorder %s1102_s26, %s854_s20 }
  0x43   : > { %p851_p1 = pnand %p849_p11, %p805_p3  ;;  %p857_p2 = scmp.lt.s32.totalorder %s855_s6, %s848_s7 }
  0x45   : > { %p852_p6 = pneg %p851_p1  ;;  %p858_p5 = por %p857_p2, %p856_p8 }
  0x47   : > { %p859_p4 = pnand %p858_p5, %p852_p6 }
  0x49   : > { %862 = shalt.err (!%p859_p4)
}
  0x4a   : > { %703 = dma.hbm_to_vmem [thread:$0]  (!%p1052_p0), %s1100_s19, 512, %s1102_s26, %s171_s30, %s952_s29, %s952_s29, %s953_s3  }
  0x4b   : > { %196 = sbr.rel (%p1093_p12) target bundleno = 167 (0xa7), region = 28  ;;  %s1136_s4 = sand.u32 (!%p1093_p12), 1, %s933_s10  }
  0x4c   : > { %s650_s27 = sshll.u32 (!%p1093_p12), %s1136_s4, 7  ;;  %s199_s28 = scalar_lea.sflag (!%p1093_p12), [#allocation3], %s1136_s4 }
  0x4d   : > { %s202_s5 = scalar_lea.vmem (!%p1093_p12), [#allocation2], %s650_s27  ;;  %p1355_p8 = scmp.ne.s32.totalorder (!%p1093_p12), %s1349_s21, 0 }
  0x52   : > { %916 = dma.done.wait (%p1355_p8), %s199_s28, 2048  }
  0x53   : > { %918 = vsyncadd (%p1355_p8), %s199_s28, 4294965248  ;;  %s651_s25 = sshll.u32 %s1136_s4, 5  ;;  %s208_s29 = scalar_lea.sflag [#allocation6], %s1136_s4 }
  0x54   : > { %s1146_s3 = scalar_lea.vmem [#allocation5], %s651_s25 }
  0x55   : > { %920 = dma.done.wait (%p1355_p8), %s208_s29, 512  }
  0x56   : > { %922 = vsyncadd (%p1355_p8), %s208_s29, 4294966784  ;;  %v258_v0 = vld [vmem:[%s202_s5] sm:$0xff]  ;;  %v259_v1 = vld [vmem:[%s202_s5 + $0x8] sm:$0xff]  ;;  %s689_s21 = smul.u32 96, %s1136_s4  ;;  %p1356_p3 = scmp.ne.s32.totalorder %s1350_s22, 0 }
  0x57   : > { %v260_v2 = vld [vmem:[%s202_s5 + $0x10] sm:$0xff]  ;;  %v261_v3 = vld [vmem:[%s202_s5 + $0x18] sm:$0xff]  ;;  %v262_v4 = vld [vmem:[%s202_s5 + $0x20] sm:$0xff]  ;;  %s690_s19 = smul.u32 1536, %s941_s12  ;;  %s509_s12 = scalar_lea.sflag [#allocation4], %s1136_s4 }
  0x58   : > { %v263_v5 = vld [vmem:[%s202_s5 + $0x28] sm:$0xff]  ;;  %v264_v6 = vld [vmem:[%s202_s5 + $0x30] sm:$0xff]  ;;  %v265_v7 = vld [vmem:[%s202_s5 + $0x38] sm:$0xff]  ;;  %v274_v9 = vmax.f32 %v258_v0, %v262_v4  ;;  %s1253_s15 = scalar_lea.vmem [#allocation7], %s689_s21  ;;  %s956_s18 = smov [#allocation7]  }
  0x59   : > { %v266_v8 = vld [vmem:[%s202_s5 + $0x40] sm:$0xff]  ;;  %v277_v10 = vmax.f32 %v259_v1, %v263_v5  ;;  %v267_v11 = vld [vmem:[%s202_s5 + $0x48] sm:$0xff]  ;;  %v268_v12 = vld [vmem:[%s202_s5 + $0x50] sm:$0xff]  ;;  %v280_v14 = vmax.f32 %v260_v2, %v264_v6  ;;  %v283_v15 = vmax.f32 %v261_v3, %v265_v7  ;;  %s523_s26 = sshll.u32 %s1253_s15, 4  ;;  %s1288_s16 = scalar_lea.hbm %s1345_s2, %s690_s19  ;;  %s1290_s26 = int_to_ptr.vmem [resolvable:$true] %s523_s26 }
  0x5a   : > { %v269_v13 = vld [vmem:[%s202_s5 + $0x58] sm:$0xff]  ;;  %v270_v16 = vld [vmem:[%s202_s5 + $0x60] sm:$0xff]  ;;  %v271_v17 = vld [vmem:[%s202_s5 + $0x68] sm:$0xff]  ;;  %v275_v19 = vmax.f32 %v274_v9, %v266_v8  ;;  %s863_s7 = scalar_lea.vmem %s1290_s26, 1536  ;;  %s867_s20 = sshll.u32 %s956_s18, 4  ;;  %s868_s20 = int_to_ptr.vmem [resolvable:$false] %s867_s20 }
  0x5b   : > { %v272_v18 = vld [vmem:[%s202_s5 + $0x70] sm:$0xff]  ;;  %v278_v20 = vmax.f32 %v277_v10, %v267_v11  ;;  %v273_v21 = vld [vmem:[%s202_s5 + $0x78] sm:$0xff]  ;;  %v281_v22 = vmax.f32 %v280_v14, %v268_v12  ;;  %v284_v23 = vmax.f32 %v283_v15, %v269_v13  ;;  %v1153_v26 = vld [vmem:[%s1146_s3] sm:$0xff]  ;;  %p864_p0 = scmp.ne.s32.totalorder %s1290_s26, %s863_s7  ;;  %s869_s6 = scalar_lea.vmem %s868_s20, 3072 }
  0x5c   : > { %v276_v24 = vmax.f32 %v275_v19, %v270_v16  ;;  %v1156_v27 = vld [vmem:[%s1146_s3 + $0x8] sm:$0xff]  ;;  %v1159_v30 = vld [vmem:[%s1146_s3 + $0x10] sm:$0xff]  ;;  %v1162_v31 = vld [vmem:[%s1146_s3 + $0x18] sm:$0xff]  ;;  %vm370_vm0 = vcmp.eq.s32.totalorder %v1153_v26, 0  ;;  %vm374_vm4 = vcmp.eq.s32.totalorder %v1153_v26, 1  ;;  %vm378_vm8 = vcmp.eq.s32.totalorder %v1153_v26, 2  ;;  %p870_p7 = scmp.lt.s32.totalorder %s1290_s26, %s868_s20  ;;  %p871_p10 = scmp.lt.s32.totalorder %s869_s6, %s863_s7 }
  0x5d   : > { %v279_v25 = vmax.f32 %v278_v20, %v271_v17  ;;  %v282_v28 = vmax.f32 %v281_v22, %v272_v18  ;;  %v285_v29 = vmax.f32 %v284_v23, %v273_v21  ;;  %vm371_vm1 = vcmp.eq.s32.totalorder %v1156_v27, 0  ;;  %p865_p12 = pnand %p864_p0, %p1356_p3 }
  0x5e   : > { %v286_v32 = vsub.f32 %v258_v0, %v276_v24  ;;  %v290_v36 = vsub.f32 %v262_v4, %v276_v24  ;;  %vm372_vm2 = vcmp.eq.s32.totalorder %v1159_v30, 0  ;;  %vm373_vm3 = vcmp.eq.s32.totalorder %v1162_v31, 0  ;;  %p872_p9 = por %p871_p10, %p870_p7 }
  0x5f   : > { %v287_v33 = vsub.f32 %v259_v1, %v279_v25  ;;  %v288_v34 = vsub.f32 %v260_v2, %v282_v28  ;;  %v289_v35 = vsub.f32 %v261_v3, %v285_v29  ;;  %v291_v37 = vsub.f32 %v263_v5, %v279_v25  ;;  %p866_p13 = pneg %p865_p12 }
  0x60   : > { %v292_v38 = vsub.f32 %v264_v6, %v282_v28  ;;  %v293_v39 = vsub.f32 %v265_v7, %v285_v29  ;;  %v294_v40 = vsub.f32 %v266_v8, %v276_v24  ;;  %v295_v41 = vsub.f32 %v267_v11, %v279_v25 }
  0x61   : > { %v296_v42 = vsub.f32 %v268_v12, %v282_v28  ;;  %v302_v43 = vmul.f32 1.442695, %v286_v32  ;;  %v304_v44 = vmul.f32 1.442695, %v287_v33  ;;  %v306_v45 = vmul.f32 1.442695, %v288_v34  ;;  %p873_p11 = pnand %p872_p9, %p866_p13 }
  0x62   : > { %v297_v46 = vsub.f32 %v269_v13, %v285_v29  ;;  %v298_v47 = vsub.f32 %v270_v16, %v276_v24  ;;  %v299_v48 = vsub.f32 %v271_v17, %v279_v25  ;;  %v308_v49 = vmul.f32 1.442695, %v289_v35 }
  0x63   : > { %v300_v50 = vsub.f32 %v272_v18, %v282_v28  ;;  %v301_v51 = vsub.f32 %v273_v21, %v285_v29  ;;  %763 = vpow2.f32 %v302_v43  ;;  %v310_v52 = vmul.f32 1.442695, %v290_v36 }
  0x64   : > { %765 = vpow2.f32 %v304_v44  ;;  %v312_v53 = vmul.f32 1.442695, %v291_v37  ;;  %v314_v54 = vmul.f32 1.442695, %v292_v38  ;;  %v316_v55 = vmul.f32 1.442695, %v293_v39 }
  0x65   : > { %767 = vpow2.f32 %v306_v45  ;;  %v318_v56 = vmul.f32 1.442695, %v294_v40  ;;  %v320_v57 = vmul.f32 1.442695, %v295_v41  ;;  %v322_v58 = vmul.f32 1.442695, %v296_v42 }
  0x66   : > { %769 = vpow2.f32 %v308_v49  ;;  %v324_v59 = vmul.f32 1.442695, %v297_v46  ;;  %v326_v60 = vmul.f32 1.442695, %v298_v47  ;;  %v328_v61 = vmul.f32 1.442695, %v299_v48 }
  0x67   : > { %771 = vpow2.f32 %v310_v52  ;;  %v330_v62 = vmul.f32 1.442695, %v300_v50  ;;  %v332_v63 = vmul.f32 1.442695, %v301_v51  ;;  %v955_v0 = vmov 0.0  }
  0x68   : > { %773 = vpow2.f32 %v312_v53  ;;  %v1171_v1 = vsel %vm370_vm0, 1.0, %v955_v0  ;;  %v1175_v2 = vsel %vm371_vm1, 1.0, %v955_v0  ;;  %vm375_vm5 = vcmp.eq.s32.totalorder %v1156_v27, 1 }
  0x69   : > { %775 = vpow2.f32 %v314_v54  ;;  %v1180_v3 = vsel %vm372_vm2, 1.0, %v955_v0  ;;  %vm376_vm6 = vcmp.eq.s32.totalorder %v1159_v30, 1  ;;  %vm377_vm7 = vcmp.eq.s32.totalorder %v1162_v31, 1 }
  0x6a   : > { %777 = vpow2.f32 %v316_v55  ;;  %v1186_v4 = vsel %vm373_vm3, 1.0, %v955_v0  ;;  %v1188_v5 = vsel %vm374_vm4, 1.0, %v955_v0  ;;  %v1191_v6 = vsel %vm375_vm5, 1.0, %v955_v0 }
  0x6b   : > { %779 = vpow2.f32 %v318_v56  ;;  %vm379_vm9 = vcmp.eq.s32.totalorder %v1156_v27, 2  ;;  %vm380_vm10 = vcmp.eq.s32.totalorder %v1159_v30, 2  ;;  %v1195_v7 = vsel %vm376_vm6, 1.0, %v955_v0 }
  0x6c   : > { %781 = vpow2.f32 %v320_v57  ;;  %v1197_v8 = vsel %vm377_vm7, 1.0, %v955_v0  ;;  %vm381_vm11 = vcmp.eq.s32.totalorder %v1162_v31, 2  ;;  %v1202_v10 = vsel %vm378_vm8, 1.0, %v955_v0 }
  0x6d   : > { %v1200_v9 = vpop.eup %763  ;;  %783 = vpow2.f32 %v322_v58  ;;  %vm382_vm12 = vcmp.eq.s32.totalorder %v1153_v26, 3  ;;  %vm383_vm13 = vcmp.eq.s32.totalorder %v1156_v27, 3  ;;  %v1208_v12 = vsel %vm379_vm9, 1.0, %v955_v0 }
  0x6e   : > { %v1206_v11 = vpop.eup %765  ;;  %785 = vpow2.f32 %v324_v59  ;;  %v1210_v13 = vsel %vm380_vm10, 1.0, %v955_v0  ;;  %vm384_vm14 = vcmp.eq.s32.totalorder %v1159_v30, 3  ;;  %v1215_v15 = vsel %vm382_vm12, 1.0, %v955_v0 }
  0x6f   : > { %v1213_v14 = vpop.eup %767  ;;  %787 = vpow2.f32 %v326_v60  ;;  %v1217_v16 = vsel %vm383_vm13, 1.0, %v955_v0  ;;  %v488_v17 = vadd.f32 %v1175_v2, %v1171_v1  ;;  %v491_v19 = vadd.f32 %v1191_v6, %v1188_v5 }
  0x70   : > { %v1221_v18 = vpop.eup %769  ;;  %789 = vpow2.f32 %v328_v61  ;;  %v494_v20 = vadd.f32 %v1208_v12, %v1202_v10  ;;  %v497_v21 = vadd.f32 %v1217_v16, %v1215_v15  ;;  %vm385_vm15 = vcmp.eq.s32.totalorder %v1162_v31, 3 }
  0x71   : > { %v772_v22 = vpop.eup %771  ;;  %791 = vpow2.f32 %v330_v62  ;;  %v1231_v23 = vsel %vm384_vm14, 1.0, %v955_v0  ;;  %v489_v24 = vadd.f32 %v1180_v3, %v488_v17  ;;  %v492_v27 = vadd.f32 %v1195_v7, %v491_v19 }
  0x72   : > { %v774_v25 = vpop.eup %773  ;;  %793 = vpow2.f32 %v332_v63  ;;  %v334_v26 = vadd.f32 %v772_v22, %v1200_v9  ;;  %v495_v28 = vadd.f32 %v1210_v13, %v494_v20  ;;  %v1240_v32 = vsel %vm381_vm11, 1.0, %v955_v0 }
  0x73   : > { %v776_v29 = vpop.eup %775  ;;  %v337_v30 = vadd.f32 %v774_v25, %v1206_v11  ;;  %v490_v33 = vadd.f32 %v1186_v4, %v489_v24  ;;  %v498_v34 = vadd.f32 %v1231_v23, %v497_v21  ;;  %v1245_v37 = vsel %vm385_vm15, 1.0, %v955_v0 }
  0x74   : > { %v778_v35 = vpop.eup %777  ;;  %v340_v36 = vadd.f32 %v776_v29, %v1213_v14  ;;  %v493_v38 = vadd.f32 %v1197_v8, %v492_v27  ;;  %v496_v39 = vadd.f32 %v1240_v32, %v495_v28 }
  0x75   : > { %v780_v40 = vpop.eup %779  ;;  %v343_v41 = vadd.f32 %v778_v35, %v1221_v18  ;;  %v499_v31 = vadd.f32 %v1245_v37, %v498_v34  ;;  %680 = vst [vmem:[%s1253_s15 + $0x40] sm:$0xff] %v490_v33 }
  0x76   : > { %v782_v42 = vpop.eup %781  ;;  %v335_v43 = vadd.f32 %v780_v40, %v334_v26  ;;  %681 = vst [vmem:[%s1253_s15 + $0x48] sm:$0xff] %v493_v38  ;;  %682 = vst [vmem:[%s1253_s15 + $0x50] sm:$0xff] %v496_v39 }
  0x77   : > { %v784_v44 = vpop.eup %783  ;;  %v338_v45 = vadd.f32 %v782_v42, %v337_v30  ;;  %683 = vst [vmem:[%s1253_s15 + $0x58] sm:$0xff] %v499_v31 }
  0x78   : > { %v786_v46 = vpop.eup %785  ;;  %v341_v47 = vadd.f32 %v784_v44, %v340_v36 }
  0x79   : > { %v788_v48 = vpop.eup %787  ;;  %v344_v49 = vadd.f32 %v786_v46, %v343_v41 }
  0x7a   : > { %v790_v50 = vpop.eup %789  ;;  %v336_v51 = vadd.f32 %v788_v48, %v335_v43 }
  0x7b   : > { %v792_v52 = vpop.eup %791  ;;  %v339_v53 = vadd.f32 %v790_v50, %v338_v45 }
  0x7c   : > { %v794_v54 = vpop.eup %793  ;;  %v342_v55 = vadd.f32 %v792_v52, %v341_v47  ;;  %795 = vrcp.f32 %v336_v51 }
  0x7d   : > { %v345_v56 = vadd.f32 %v794_v54, %v344_v49  ;;  %797 = vrcp.f32 %v339_v53 }
  0x7e   : > { %799 = vrcp.f32 %v342_v55 }
  0x7f   : > { %801 = vrcp.f32 %v345_v56 }
  0x86   : > { %v796_v57 = vpop.eup %795 }
  0x87   : > { %v798_v58 = vpop.eup %797  ;;  %v350_v59 = vmul.f32 %v796_v57, %v1200_v9  ;;  %v354_v60 = vmul.f32 %v796_v57, %v772_v22  ;;  %v358_v61 = vmul.f32 %v796_v57, %v780_v40  ;;  %v362_v62 = vmul.f32 %v796_v57, %v788_v48 }
  0x88   : > { %v800_v63 = vpop.eup %799  ;;  %v351_v0 = vmul.f32 %v798_v58, %v1206_v11  ;;  %v355_v17 = vmul.f32 %v798_v58, %v774_v25  ;;  %v359_v19 = vmul.f32 %v798_v58, %v782_v42  ;;  %v363_v20 = vmul.f32 %v798_v58, %v790_v50 }
  0x89   : > { %v802_v21 = vpop.eup %801  ;;  %v352_v24 = vmul.f32 %v800_v63, %v1213_v14  ;;  %v418_v26 = vmul.f32 %v1171_v1, %v350_v59  ;;  %v356_v27 = vmul.f32 %v800_v63, %v776_v29  ;;  %v422_v28 = vmul.f32 %v1188_v5, %v354_v60 }
  0x8a   : > { %v353_v30 = vmul.f32 %v802_v21, %v1221_v18  ;;  %v419_v9 = vmul.f32 %v1175_v2, %v351_v0  ;;  %v357_v22 = vmul.f32 %v802_v21, %v778_v35  ;;  %v423_v33 = vmul.f32 %v1191_v6, %v355_v17 }
  0x8b   : > { %v420_v11 = vmul.f32 %v1180_v3, %v352_v24  ;;  %v424_v25 = vmul.f32 %v1195_v7, %v356_v27  ;;  %v360_v34 = vmul.f32 %v800_v63, %v784_v44  ;;  %v361_v36 = vmul.f32 %v802_v21, %v786_v46 }
  0x8c   : > { %v421_v14 = vmul.f32 %v1186_v4, %v353_v30  ;;  %v438_v38 = vadd.f32 %v419_v9, %v418_v26  ;;  %v425_v1 = vmul.f32 %v1197_v8, %v357_v22  ;;  %v441_v29 = vadd.f32 %v423_v33, %v422_v28 }
  0x8d   : > { %v426_v5 = vmul.f32 %v1202_v10, %v358_v61  ;;  %v427_v18 = vmul.f32 %v1208_v12, %v359_v19  ;;  %v428_v2 = vmul.f32 %v1210_v13, %v360_v34  ;;  %v429_v6 = vmul.f32 %v1240_v32, %v361_v36 }
  0x8e   : > { %v439_v35 = vadd.f32 %v438_v38, %v420_v11  ;;  %v442_v3 = vadd.f32 %v441_v29, %v424_v25  ;;  %v364_v39 = vmul.f32 %v800_v63, %v792_v52  ;;  %v365_v7 = vmul.f32 %v802_v21, %v794_v54 }
  0x8f   : > { %v444_v40 = vadd.f32 %v427_v18, %v426_v5  ;;  %v430_v41 = vmul.f32 %v1215_v15, %v362_v62  ;;  %v431_v4 = vmul.f32 %v1217_v16, %v363_v20  ;;  %v463_v8 = vadd.f32 %v351_v0, %v350_v59 }
  0x90   : > { %v440_v31 = vadd.f32 %v439_v35, %v421_v14  ;;  %v443_v10 = vadd.f32 %v442_v3, %v425_v1  ;;  %v432_v12 = vmul.f32 %v1231_v23, %v364_v39  ;;  %v433_v13 = vmul.f32 %v1245_v37, %v365_v7 }
  0x91   : > { %v445_v32 = vadd.f32 %v444_v40, %v428_v2  ;;  %v447_v42 = vadd.f32 %v431_v4, %v430_v41  ;;  %v464_v43 = vadd.f32 %v463_v8, %v352_v24  ;;  %v466_v44 = vadd.f32 %v355_v17, %v354_v60 }
  0x92   : > { %v469_v45 = vadd.f32 %v359_v19, %v358_v61  ;;  %v472_v15 = vadd.f32 %v363_v20, %v362_v62  ;;  %454 = vst [vmem:[%s1253_s15] sm:$0xff] %v440_v31  ;;  %455 = vst [vmem:[%s1253_s15 + $0x8] sm:$0xff] %v443_v10 }
  0x93   : > { %v446_v16 = vadd.f32 %v445_v32, %v429_v6  ;;  %v448_v46 = vadd.f32 %v447_v42, %v432_v12  ;;  %v465_v47 = vadd.f32 %v464_v43, %v353_v30  ;;  %v467_v48 = vadd.f32 %v466_v44, %v356_v27 }
  0x94   : > { %v470_v23 = vadd.f32 %v469_v45, %v360_v34  ;;  %v473_v37 = vadd.f32 %v472_v15, %v364_v39 }
  0x95   : > { %v449_v49 = vadd.f32 %v448_v46, %v433_v13  ;;  %v468_v50 = vadd.f32 %v467_v48, %v357_v22  ;;  %456 = vst [vmem:[%s1253_s15 + $0x10] sm:$0xff] %v446_v16  ;;  %672 = vst [vmem:[%s1253_s15 + $0x20] sm:$0xff] %v465_v47 }
  0x96   : > { %v471_v51 = vadd.f32 %v470_v23, %v361_v36  ;;  %v474_v52 = vadd.f32 %v473_v37, %v365_v7 }
  0x97   : > { %457 = vst [vmem:[%s1253_s15 + $0x18] sm:$0xff] %v449_v49  ;;  %673 = vst [vmem:[%s1253_s15 + $0x28] sm:$0xff] %v468_v50 }
  0x98   : > { %674 = vst [vmem:[%s1253_s15 + $0x30] sm:$0xff] %v471_v51  ;;  %675 = vst [vmem:[%s1253_s15 + $0x38] sm:$0xff] %v474_v52 }
  0x99   : > { %876 = shalt.err (!%p873_p11)
}
  0x9a   : > { %s877_s27 = scalar_lea.hbm %s1288_s16, 1536  ;;  %s881_s25 = scalar_lea.hbm %s1345_s2, 3072 }
  0x9b   : > { %p878_p1 = scmp.ne.s32.totalorder %s1288_s16, %s877_s27  ;;  %p882_p5 = scmp.lt.u32.totalorder %s1288_s16, %s1345_s2 }
  0x9c   : > { %p883_p4 = scmp.lt.u32.totalorder %s881_s25, %s877_s27  ;;  %p885_p0 = scmp.lt.u32.totalorder %s877_s27, %s1288_s16 }
  0x9d   : > { %p879_p6 = pnand %p878_p1, %p1356_p3 }
  0x9e   : > { %p884_p8 = por %p883_p4, %p882_p5 }
  0x9f   : > { %p880_p2 = pneg %p879_p6 }
  0xa0   : > { %p886_p12 = por %p885_p0, %p884_p8 }
  0xa2   : > { %p887_p13 = pnand %p886_p12, %p880_p2 }
  0xa4   : > { %890 = shalt.err (!%p887_p13)
}
  0xa5   : > { %s957_s21 = smov 128   ;;  %s958_s15 = smov 8  }
  0xa6   : > { %695 = dma.vmem_to_hbm [thread:$0]  (%p1356_p3), %s1290_s26, 1536, %s1288_s16, %s509_s12, %s957_s21, %s957_s21, %s958_s15  }
  0xa7 PF: > { %s538_s19 = sand.u32 1, %s929_s9   ;;  %p1357_p7 = scmp.ne.s32.totalorder %s1351_s24, 0 }
  0xa8   : > { %p1358_p10 = scmp.ge.s32.totalorder %s949_s14, 2  ;;  %s539_s30 = scalar_lea.sflag [#allocation4], %s538_s19 }
  0xaa   : > { %p705_p9 = pnand %p1358_p10, %p1357_p7 }
  0xac   : > { %924 = dma.done.wait (!%p705_p9), %s539_s30, 1536  }
  0xad   : > { %926 = vsyncadd (!%p705_p9), %s539_s30, 4294965760  ;;  %s21_s14 = sadd.s32 1, %s949_s14   ;;  %s1359_s9 = smov %s933_s10 }
  0xae   : > { %p18_p11 = scmp.ge.s32.totalorder %s21_s14, 4   ;;  %s1360_s10 = smov %s937_s11 }
  0xaf   : > { %s1361_s11 = smov %s1030_s23  ;;  %s1362_s12 = smov %s945_s13 }
  0xb0   : > { %s1363_s13 = smov %s1365_s17  ;;  %20 = sbr.rel (!%p18_p11) target bundleno = 8 (0x8), region = 92 }
  0xb7   :  { %544 = vsyncpa [#allocation3], 1 }
  0xb8   :  { %546 = vsyncpa [#allocation3 + $0x1], 1 }
  0xb9   :  { %547 = vsyncpa [#allocation6], 1 }
  0xba   :  { %549 = vsyncpa [#allocation6 + $0x1], 1 }
  0xbb   :  { %550 = vsyncpa [#allocation4], 1 }
  0xbc   :  { %552 = vsyncpa [#allocation4 + $0x1], 1 }

</bundles_post_ra>
